<compile_context>
chip_gen: v7x
topology: tpu7x:2x2x1
jax: 0.10.0
libtpu: 0.0.40
codegen_flags: <defaults>
</compile_context>

<pallas_src>
import math
from functools import partial

import jax
import jax.numpy as jnp
from jax import lax
from jax.experimental import pallas as pl
from jax.experimental.pallas import tpu as pltpu

EPS = 1e-5                       # nn.LayerNorm default
MXU_DTYPE = jnp.bfloat16         # matmul-operand dtype (accumulation stays f32)
_SQRT_2_OVER_PI = math.sqrt(2.0 / math.pi)


# ----------------------------- small config helpers ------------------------------

def _vmem_limit_bytes():
    """~75% of physical VMEM, capped at 96 MiB (=> ~48 MiB on v7x, 96 MiB on v5e/v6e)."""
    try:
        cap = pltpu.get_tpu_info().vmem_capacity_bytes
    except Exception:
        cap = 128 * 1024 * 1024
    return int(min(cap * 3 // 4, 96 * 1024 * 1024))


def _resident_spec(block_shape, index_map):
    """BlockSpec for a block whose index never changes: single-buffer it if supported."""
    try:
        return pl.BlockSpec(block_shape, index_map, pipeline_mode=pl.Buffered(1))
    except Exception:   # older jax without pipeline_mode / Buffered
        return pl.BlockSpec(block_shape, index_map)


def _row_tile(rows):
    """Largest row tile (<=1024, multiple of 8 sublanes) that divides `rows`."""
    for t in (1024, 512, 256, 128, 64, 32, 16, 8):
        if rows % t == 0:
            return t
    return rows


def _seq_tile(seq):
    """Query-row tile for attention."""
    for t in (256, 128, 64, 32, 16, 8):
        if seq % t == 0:
            return t
    return seq


def _col_tile(mlp):
    """mlp-dimension column tile for the FFN (multiple of 256 when split)."""
    if mlp <= 1024:
        return mlp
    for t in (1024, 512, 256, 128):
        if mlp % t == 0:
            return t
    return mlp


# ----------------------------- shared math helpers -----------------------------

def _layernorm_f32(x, gamma, beta):
    """LayerNorm over the last axis; statistics in f32 (sum * 1/D, rsqrt on EUP)."""
    inv_d = 1.0 / x.shape[-1]
    mean = jnp.sum(x, axis=-1, keepdims=True) * inv_d
    centered = x - mean
    var = jnp.sum(centered * centered, axis=-1, keepdims=True) * inv_d
    return centered * lax.rsqrt(var + EPS) * gamma + beta


def _gelu_tanh(x):
    # TODO(synk): nn.GELU() default is the exact erf form; the tanh form used here
    # (guaranteed to lower on Mosaic) differs by < ~3e-4 absolute.
    return 0.5 * x * (1.0 + jnp.tanh(_SQRT_2_OVER_PI * (x + 0.044715 * x * x * x)))


# --------------------------------- kernels --------------------------------------

def _attn_block_kernel(x_ref, gamma_ref, beta_ref, wqkv_ref, wo_ref, bo_ref,
                       o_ref, qkv_ref, *, heads, dim_head, q_tile):
    """One (batch, q-tile) step of: out = Attention(LayerNorm(x)) + x.

    x_ref: (S, D)   full sequence of this batch element (resident across q tiles)
    o_ref: (TQ, D)  output rows for this q tile
    qkv_ref: (S, 3*inner) bf16 scratch; QKV cached once per batch element (qi == 0).
    The 1/sqrt(dim_head) scale is pre-folded into the Q columns of Wqkv.
    """
    inner = heads * dim_head
    qi = pl.program_id(1)

    @pl.when(qi == 0)
    def _():
        x = x_ref[...].astype(jnp.float32)                               # (S, D)
        y = _layernorm_f32(x, gamma_ref[...].astype(jnp.float32),
                           beta_ref[...].astype(jnp.float32))
        qkv = jnp.dot(y.astype(MXU_DTYPE), wqkv_ref[...],
                      preferred_element_type=jnp.float32)                # (S, 3*inner)
        qkv_ref[...] = qkv.astype(MXU_DTYPE)

    row0 = pl.multiple_of(qi * q_tile, q_tile)
    q = qkv_ref[pl.ds(row0, q_tile), pl.ds(0, inner)]                    # (TQ, inner) bf16
    k = qkv_ref[:, pl.ds(inner, inner)]                                  # (S, inner)  bf16
    v = qkv_ref[:, pl.ds(2 * inner, inner)]                              # (S, inner)  bf16
    seq = k.shape[0]

    # Batched-head score / context matmuls (heads kept together on the MXU).
    qh = q.reshape(q_tile, heads, dim_head).transpose(1, 0, 2)           # (H, TQ, dh)
    kh = k.reshape(seq, heads, dim_head).transpose(1, 0, 2)              # (H, S, dh)
    vh = v.reshape(seq, heads, dim_head).transpose(1, 0, 2)              # (H, S, dh)

    s = jnp.einsum("hqd,hkd->hqk", qh, kh,
                   preferred_element_type=jnp.float32)                   # (H, TQ, S) f32
    s = s - jnp.max(s, axis=-1, keepdims=True)
    p = jnp.exp(s)
    p = p * pl.reciprocal(jnp.sum(p, axis=-1, keepdims=True), approx=True)

    ctx = jnp.einsum("hqk,hkd->hqd", p.astype(MXU_DTYPE), vh,
                     preferred_element_type=jnp.float32)                 # (H, TQ, dh)
    ctx = ctx.transpose(1, 0, 2).reshape(q_tile, inner)                  # (TQ, inner)

    # Single output projection over the full inner dim (K = heads*dim_head).
    proj = jnp.dot(ctx.astype(MXU_DTYPE), wo_ref[...],
                   preferred_element_type=jnp.float32)                   # (TQ, D)
    x_rows = x_ref[pl.ds(row0, q_tile), :].astype(jnp.float32)
    o_ref[...] = (x_rows + proj + bo_ref[...].astype(jnp.float32)).astype(o_ref.dtype)


def _ffn_block_kernel(x_ref, gamma_ref, beta_ref, w1_ref, b1_ref, w2_ref, b2_ref,
                      o_ref, acc_ref, y_ref):
    """(row tile, mlp column tile) step of: out = FeedForward(LayerNorm(x)) + x.

    x_ref/o_ref: (TM, D); w1_ref: (D, TN); w2_ref: (TN, D).
    acc_ref (TM, D) f32 accumulates partial W2 products across mlp column tiles;
    y_ref (TM, D) bf16 caches LayerNorm(x) so LN runs once per row tile.
    """
    n = pl.program_id(1)

    @pl.when(n == 0)
    def _():
        x = x_ref[...].astype(jnp.float32)                               # (TM, D)
        y = _layernorm_f32(x, gamma_ref[...].astype(jnp.float32),
                           beta_ref[...].astype(jnp.float32))
        y_ref[...] = y.astype(MXU_DTYPE)
        acc_ref[...] = x + b2_ref[...].astype(jnp.float32)               # residual + bias once

    h = jnp.dot(y_ref[...], w1_ref[...], preferred_element_type=jnp.float32)
    h = _gelu_tanh(h + b1_ref[...].astype(jnp.float32))                  # (TM, TN)
    acc_ref[...] += jnp.dot(h.astype(MXU_DTYPE), w2_ref[...],
                            preferred_element_type=jnp.float32)

    @pl.when(n == pl.num_programs(1) - 1)
    def _():
        o_ref[...] = acc_ref[...].astype(o_ref.dtype)


# --------------------------------- wrappers --------------------------------------

def attention_block(x, p, *, heads, dim_head):
    """x: (B, S, D).  Returns Attention(LayerNorm(x)) + x."""
    B, S, D = x.shape
    inner = heads * dim_head
    tq = _seq_tile(S)
    n_q = S // tq

    kernel = partial(_attn_block_kernel, heads=heads, dim_head=dim_head, q_tile=tq)
    return pl.pallas_call(
        kernel,
        out_shape=jax.ShapeDtypeStruct((B, S, D), x.dtype),
        grid_spec=pltpu.PrefetchScalarGridSpec(
            num_scalar_prefetch=0,
            grid=(B, n_q),                                              # batch x q tiles
            in_specs=[
                pl.BlockSpec((None, S, D), lambda b, q: (b, 0, 0)),     # x (resident per b)
                _resident_spec((1, D), lambda b, q: (0, 0)),            # gamma
                _resident_spec((1, D), lambda b, q: (0, 0)),            # beta
                _resident_spec((D, 3 * inner), lambda b, q: (0, 0)),    # Wqkv (bf16, Q pre-scaled)
                _resident_spec((inner, D), lambda b, q: (0, 0)),        # Wo
                _resident_spec((1, D), lambda b, q: (0, 0)),            # bo
            ],
            out_specs=pl.BlockSpec((None, tq, D), lambda b, q: (b, q, 0)),
            scratch_shapes=[pltpu.VMEM((S, 3 * inner), MXU_DTYPE)],     # QKV cache per batch elem
        ),
        compiler_params=pltpu.CompilerParams(
            dimension_semantics=("parallel", "arbitrary"),
            vmem_limit_bytes=_vmem_limit_bytes(),
        ),
    )(x, p["gamma"], p["beta"], p["wqkv"], p["wo"], p["bo"])


def feedforward_block(x, p):
    """x: (B, S, D).  Returns FeedForward(LayerNorm(x)) + x (rows x mlp-column tiled)."""
    B, S, D = x.shape
    mlp = p["w1"].shape[1]
    rows = B * S
    x2d = x.reshape(rows, D)
    tm = _row_tile(rows)
    tn = _col_tile(mlp)

    out2d = pl.pallas_call(
        _ffn_block_kernel,
        out_shape=jax.ShapeDtypeStruct((rows, D), x.dtype),
        grid_spec=pltpu.PrefetchScalarGridSpec(
            num_scalar_prefetch=0,
            grid=(rows // tm, mlp // tn),
            in_specs=[
                pl.BlockSpec((tm, D), lambda i, n: (i, 0)),             # x row tile
                _resident_spec((1, D), lambda i, n: (0, 0)),            # gamma
                _resident_spec((1, D), lambda i, n: (0, 0)),            # beta
                pl.BlockSpec((D, tn), lambda i, n: (0, n)),             # W1 column tile (streamed)
                pl.BlockSpec((1, tn), lambda i, n: (0, n)),             # b1
                pl.BlockSpec((tn, D), lambda i, n: (n, 0)),             # W2 row tile   (streamed)
                _resident_spec((1, D), lambda i, n: (0, 0)),            # b2
            ],
            out_specs=pl.BlockSpec((tm, D), lambda i, n: (i, 0)),       # accumulated over n
            scratch_shapes=[pltpu.VMEM((tm, D), jnp.float32),           # f32 accumulator
                            pltpu.VMEM((tm, D), MXU_DTYPE)],            # cached LN(x)
        ),
        compiler_params=pltpu.CompilerParams(
            dimension_semantics=("parallel", "arbitrary"),
            vmem_limit_bytes=_vmem_limit_bytes(),
        ),
    )(x2d, p["gamma"], p["beta"], p["w1"], p["b1"], p["w2"], p["b2"])
    return out2d.reshape(B, S, D)


def transformer_forward(x, layers, *, heads, dim_head):
    for layer in layers:
        x = attention_block(x, layer["attn"], heads=heads, dim_head=dim_head)
        x = feedforward_block(x, layer["ff"])
    return x


# --------------------------- parameters & reference ------------------------------

def init_params(key, dim, depth, heads, dim_head, mlp_dim):
    """Raw f32 parameters (PyTorch-like)."""
    inner = heads * dim_head
    layers = []
    for _ in range(depth):
        key, *ks = jax.random.split(key, 12)     # 11 subkeys consumed below
        ks = iter(ks)
        attn = dict(
            gamma=1.0 + 0.1 * jax.random.normal(next(ks), (dim,), jnp.float32),
            beta=0.05 * jax.random.normal(next(ks), (dim,), jnp.float32),
            wqkv=jax.random.normal(next(ks), (dim, 3 * inner), jnp.float32) / math.sqrt(dim),
            wo=jax.random.normal(next(ks), (inner, dim), jnp.float32) / math.sqrt(inner),
            bo=0.05 * jax.random.normal(next(ks), (dim,), jnp.float32),
        )
        ff = dict(
            gamma=1.0 + 0.1 * jax.random.normal(next(ks), (dim,), jnp.float32),
            beta=0.05 * jax.random.normal(next(ks), (dim,), jnp.float32),
            w1=jax.random.normal(next(ks), (dim, mlp_dim), jnp.float32) / math.sqrt(dim),
            b1=0.05 * jax.random.normal(next(ks), (mlp_dim,), jnp.float32),
            w2=jax.random.normal(next(ks), (mlp_dim, dim), jnp.float32) / math.sqrt(mlp_dim),
            b2=0.05 * jax.random.normal(next(ks), (dim,), jnp.float32),
        )
        layers.append({"attn": attn, "ff": ff})
    return layers


def prepare_params(layers, *, heads, dim_head):
    """One-time conversion for the kernels: fold 1/sqrt(dh) into Wqkv's Q columns (in f32),
    cast weights to bf16, reshape biases/affines to (1, D)-style rows."""
    inner = heads * dim_head
    scale = dim_head ** (-0.5)
    prepped = []
    for layer in layers:
        a, f = layer["attn"], layer["ff"]
        wqkv = a["wqkv"].astype(jnp.float32).at[:, :inner].multiply(scale)
        attn = dict(
            gamma=a["gamma"].reshape(1, -1).astype(jnp.float32),
            beta=a["beta"].reshape(1, -1).astype(jnp.float32),
            wqkv=wqkv.astype(MXU_DTYPE),
            wo=a["wo"].astype(MXU_DTYPE),
            bo=a["bo"].reshape(1, -1).astype(jnp.float32),
        )
        ff = dict(
            gamma=f["gamma"].reshape(1, -1).astype(jnp.float32),
            beta=f["beta"].reshape(1, -1).astype(jnp.float32),
            w1=f["w1"].astype(MXU_DTYPE),
            b1=f["b1"].reshape(1, -1).astype(jnp.float32),
            w2=f["w2"].astype(MXU_DTYPE),
            b2=f["b2"].reshape(1, -1).astype(jnp.float32),
        )
        prepped.append({"attn": attn, "ff": ff})
    return prepped


def reference_transformer(x, layers, heads, dim_head, mxu_dtype=None, exact_gelu=True):
    """Pure-JAX reference on raw params. mxu_dtype=None: full-f32 PyTorch semantics;
    mxu_dtype=bf16 + exact_gelu=False mirrors the kernel's mixed precision."""
    def cast(a):
        return a if mxu_dtype is None else a.astype(mxu_dtype)

    B, S, D = x.shape
    inner = heads * dim_head
    scale = dim_head ** (-0.5)
    x = x.astype(jnp.float32)
    for p in layers:
        a = p["attn"]
        y = _layernorm_f32(x, a["gamma"], a["beta"])
        wqkv = a["wqkv"].astype(jnp.float32).at[:, :inner].multiply(scale)  # fold scale like kernel
        qkv = jnp.einsum("bsd,de->bse", cast(y), cast(wqkv),
                         preferred_element_type=jnp.float32)
        q, k, v = jnp.split(qkv, 3, axis=-1)
        q = q.reshape(B, S, heads, dim_head).transpose(0, 2, 1, 3)
        k = k.reshape(B, S, heads, dim_head).transpose(0, 2, 1, 3)
        v = v.reshape(B, S, heads, dim_head).transpose(0, 2, 1, 3)
        dots = jnp.einsum("bhqd,bhkd->bhqk", cast(q), cast(k),
                          preferred_element_type=jnp.float32)
        attn = jax.nn.softmax(dots, axis=-1)
        out = jnp.einsum("bhqk,bhkd->bhqd", cast(attn), cast(v),
                         preferred_element_type=jnp.float32)
        out = out.transpose(0, 2, 1, 3).reshape(B, S, inner)
        out = jnp.einsum("bsi,id->bsd", cast(out), cast(a["wo"]),
                         preferred_element_type=jnp.float32) + a["bo"]
        x = x + out

        f = p["ff"]
        y = _layernorm_f32(x, f["gamma"], f["beta"])
        h = jnp.einsum("bsd,dm->bsm", cast(y), cast(f["w1"]),
                       preferred_element_type=jnp.float32) + f["b1"]
        h = jax.nn.gelu(h, approximate=False) if exact_gelu else _gelu_tanh(h)
        out = jnp.einsum("bsm,md->bsd", cast(h), cast(f["w2"]),
                         preferred_element_type=jnp.float32) + f["b2"]
        x = x + out
    return x


# ------------------------------------ main ---------------------------------------

if __name__ == "__main__":
    key = jax.random.PRNGKey(0)
    # Small Transformer consistent with the module: dim=32, depth=2, heads=4,
    # dim_head=8, mlp_dim=64; batch=2, seq=8.
    B, S = 2, 8
    dim, depth, heads, dim_head, mlp_dim = 32, 2, 4, 8, 64

    k_x, k_p = jax.random.split(key)
    x = jax.random.normal(k_x, (B, S, dim), dtype=jnp.float32)
    raw_layers = init_params(k_p, dim, depth, heads, dim_head, mlp_dim)
    layers = prepare_params(raw_layers, heads=heads, dim_head=dim_head)   # one-time bf16 convert

    out = transformer_forward(x, layers, heads=heads, dim_head=dim_head)
    jax.block_until_ready(out)
    assert out.shape == (B, S, dim)

    # Tight check vs a reference mirroring the kernel's mixed precision
    # (bf16 matmul operands, f32 accumulation, folded scale, tanh GELU).
    ref_mixed = reference_transformer(x, raw_layers, heads, dim_head,
                                      mxu_dtype=MXU_DTYPE, exact_gelu=False)
    assert jnp.allclose(out, ref_mixed, atol=2e-2, rtol=2e-2), \
        "mismatch vs mixed-precision reference"

    # Sanity check vs the exact f32 PyTorch-semantics reference (looser tolerance
    # accounts for the intentional bf16 MXU operands + tanh GELU).
    ref_f32 = reference_transformer(x, raw_layers, heads, dim_head,
                                    mxu_dtype=None, exact_gelu=True)
    assert jnp.allclose(out, ref_f32, atol=1e-1, rtol=1e-1), \
        "mismatch vs f32 reference"

    print("KERNEL_OK")
</pallas_src>

<mosaic_0001>
module attributes {stable_mosaic.version = 11 : i64} {
  func.func @_attn_block_kernel(%arg0: i32, %arg1: i32, %arg2: memref<1x8x32xf32, #tpu.memory_space<vmem>>, %arg3: memref<1x32xf32, #tpu.memory_space<vmem>>, %arg4: memref<1x32xf32, #tpu.memory_space<vmem>>, %arg5: memref<32x96xbf16, #tpu.memory_space<vmem>>, %arg6: memref<32x32xbf16, #tpu.memory_space<vmem>>, %arg7: memref<1x32xf32, #tpu.memory_space<vmem>>, %arg8: memref<1x8x32xf32, #tpu.memory_space<vmem>>, %arg9: memref<8x96xbf16, #tpu.memory_space<vmem>>) attributes {dimension_semantics = [#tpu.dimension_semantics<parallel>, #tpu.dimension_semantics<arbitrary>], iteration_bounds = array<i64: 2, 1>, scalar_prefetch = 0 : i64, scratch_operands = 1 : i64, tpu.core_type = #tpu.core_type<tc>, window_params = [{transform_indices = @transform_0, window_bounds = array<i64: 1, 8, 32>}, {pipeline_mode = #tpu.pipeline_mode<synchronous>, transform_indices = @transform_1, window_bounds = array<i64: 1, 32>}, {pipeline_mode = #tpu.pipeline_mode<synchronous>, transform_indices = @transform_2, window_bounds = array<i64: 1, 32>}, {pipeline_mode = #tpu.pipeline_mode<synchronous>, transform_indices = @transform_3, window_bounds = array<i64: 32, 96>}, {pipeline_mode = #tpu.pipeline_mode<synchronous>, transform_indices = @transform_4, window_bounds = array<i64: 32, 32>}, {pipeline_mode = #tpu.pipeline_mode<synchronous>, transform_indices = @transform_5, window_bounds = array<i64: 1, 32>}, {transform_indices = @transform_6, window_bounds = array<i64: 1, 8, 32>}]} {
    %c0_i32 = arith.constant 0 : i32
    %0 = arith.cmpi eq, %arg1, %c0_i32 : i32
    %1 = arith.extui %0 : i1 to i32
    %c0_i32_0 = arith.constant 0 : i32
    %2 = arith.cmpi ne, %1, %c0_i32_0 : i32
    scf.if %2 {
      %c0_16 = arith.constant 0 : index
      %c0_17 = arith.constant 0 : index
      %c0_18 = arith.constant 0 : index
      %43 = vector.load %arg2[%c0_16, %c0_17, %c0_18] : memref<1x8x32xf32, #tpu.memory_space<vmem>>, vector<1x8x32xf32>
      %44 = vector.shape_cast %43 : vector<1x8x32xf32> to vector<8x32xf32>
      %c0_19 = arith.constant 0 : index
      %c0_20 = arith.constant 0 : index
      %45 = vector.load %arg3[%c0_19, %c0_20] : memref<1x32xf32, #tpu.memory_space<vmem>>, vector<1x32xf32>
      %c0_21 = arith.constant 0 : index
      %c0_22 = arith.constant 0 : index
      %46 = vector.load %arg4[%c0_21, %c0_22] : memref<1x32xf32, #tpu.memory_space<vmem>>, vector<1x32xf32>
      %cst_23 = arith.constant dense<0.000000e+00> : vector<8xf32>
      %47 = vector.multi_reduction <add>, %44, %cst_23 [1] : vector<8x32xf32> to vector<8xf32>
      %48 = vector.shape_cast %47 : vector<8xf32> to vector<8x1xf32>
      %cst_24 = arith.constant 3.125000e-02 : f32
      %49 = vector.broadcast %cst_24 : f32 to vector<8x1xf32>
      %50 = arith.mulf %48, %49 : vector<8x1xf32>
      %51 = vector.broadcast %50 : vector<8x1xf32> to vector<8x32xf32>
      %52 = arith.subf %44, %51 : vector<8x32xf32>
      %53 = arith.mulf %52, %52 : vector<8x32xf32>
      %cst_25 = arith.constant dense<0.000000e+00> : vector<8xf32>
      %54 = vector.multi_reduction <add>, %53, %cst_25 [1] : vector<8x32xf32> to vector<8xf32>
      %55 = vector.shape_cast %54 : vector<8xf32> to vector<8x1xf32>
      %cst_26 = arith.constant 3.125000e-02 : f32
      %56 = vector.broadcast %cst_26 : f32 to vector<8x1xf32>
      %57 = arith.mulf %55, %56 : vector<8x1xf32>
      %cst_27 = arith.constant 9.99999974E-6 : f32
      %58 = vector.broadcast %cst_27 : f32 to vector<8x1xf32>
      %59 = arith.addf %57, %58 : vector<8x1xf32>
      %60 = math.rsqrt %59 : vector<8x1xf32>
      %61 = vector.broadcast %60 : vector<8x1xf32> to vector<8x32xf32>
      %62 = arith.mulf %52, %61 : vector<8x32xf32>
      %63 = vector.broadcast %45 : vector<1x32xf32> to vector<8x32xf32>
      %64 = arith.mulf %62, %63 : vector<8x32xf32>
      %65 = vector.broadcast %46 : vector<1x32xf32> to vector<8x32xf32>
      %66 = arith.addf %64, %65 : vector<8x32xf32>
      %67 = arith.truncf %66 : vector<8x32xf32> to vector<8x32xbf16>
      %c0_28 = arith.constant 0 : index
      %c0_29 = arith.constant 0 : index
      %68 = vector.load %arg5[%c0_28, %c0_29] : memref<32x96xbf16, #tpu.memory_space<vmem>>, vector<32x96xbf16>
      %cst_30 = arith.constant dense<0.000000e+00> : vector<8x96xf32>
      %69 = tpu.matmul %67, %68, %cst_30 {dimension_numbers = #tpu.dot_dimension_numbers<[1], [0], [0], [1], [0, 0, 1, 1], [], []>} : vector<8x32xbf16>, vector<32x96xbf16>, vector<8x96xf32> -> vector<8x96xf32>
      %70 = arith.truncf %69 : vector<8x96xf32> to vector<8x96xbf16>
      %c0_31 = arith.constant 0 : index
      %c0_32 = arith.constant 0 : index
      %71 = vector.load %arg9[%c0_31, %c0_32] : memref<8x96xbf16, #tpu.memory_space<vmem>>, vector<8x96xbf16>
      tpu.vector_store %arg9[%c0_31, %c0_32], %70 {strides = array<i32>} : memref<8x96xbf16, #tpu.memory_space<vmem>>, vector<8x96xbf16>,
    } else {
    }
    %c8_i32 = arith.constant 8 : i32
    %3 = arith.muli %arg1, %c8_i32 : i32
    %4 = tpu.assume_multiple %3, 8 : i32
    %5 = arith.index_cast %4 : i32 to index
    %c0 = arith.constant 0 : index
    %6 = vector.load %arg9[%5, %c0] : memref<8x96xbf16, #tpu.memory_space<vmem>>, vector<8x32xbf16>
    %c0_1 = arith.constant 0 : index
    %c32 = arith.constant 32 : index
    %7 = vector.load %arg9[%c0_1, %c32] : memref<8x96xbf16, #tpu.memory_space<vmem>>, vector<8x32xbf16>
    %c0_2 = arith.constant 0 : index
    %c64 = arith.constant 64 : index
    %8 = vector.load %arg9[%c0_2, %c64] : memref<8x96xbf16, #tpu.memory_space<vmem>>, vector<8x32xbf16>
    %9 = vector.shape_cast %6 : vector<8x32xbf16> to vector<8x4x8xbf16>
    %10 = tpu.transpose %9, [1, 0, 2] : vector<8x4x8xbf16> -> vector<4x8x8xbf16>
    %11 = vector.shape_cast %7 : vector<8x32xbf16> to vector<8x4x8xbf16>
    %12 = tpu.transpose %11, [1, 0, 2] : vector<8x4x8xbf16> -> vector<4x8x8xbf16>
    %13 = vector.shape_cast %8 : vector<8x32xbf16> to vector<8x4x8xbf16>
    %14 = tpu.transpose %13, [1, 0, 2] : vector<8x4x8xbf16> -> vector<4x8x8xbf16>
    "tpu.trace_start"() <{level = 10 : i32, message = "hqd,hkd->hqk"}> : () -> ()
    %cst = arith.constant dense<0.000000e+00> : vector<4x8x8xf32>
    %15 = tpu.matmul %10, %12, %cst {dimension_numbers = #tpu.dot_dimension_numbers<[2], [2], [1], [1], [0, 0, 0, 1, 1, 1], [0], [0]>} : vector<4x8x8xbf16>, vector<4x8x8xbf16>, vector<4x8x8xf32> -> vector<4x8x8xf32>
    "tpu.trace_stop"() : () -> ()
    %cst_3 = arith.constant dense<0xFF800000> : vector<4x8xf32>
    %16 = vector.multi_reduction <maximumf>, %15, %cst_3 [2] : vector<4x8x8xf32> to vector<4x8xf32>
    %17 = vector.shape_cast %16 : vector<4x8xf32> to vector<4x8x1xf32>
    %18 = vector.broadcast %17 : vector<4x8x1xf32> to vector<4x8x8xf32>
    %19 = arith.subf %15, %18 : vector<4x8x8xf32>
    %20 = math.exp %19 : vector<4x8x8xf32>
    %cst_4 = arith.constant dense<0.000000e+00> : vector<4x8xf32>
    %21 = vector.multi_reduction <add>, %20, %cst_4 [2] : vector<4x8x8xf32> to vector<4x8xf32>
    %22 = vector.shape_cast %21 : vector<4x8xf32> to vector<4x8x1xf32>
    %23 = tpu.reciprocal %22 {approx = true} : vector<4x8x1xf32> -> vector<4x8x1xf32>
    %24 = vector.broadcast %23 : vector<4x8x1xf32> to vector<4x8x8xf32>
    %25 = arith.mulf %20, %24 : vector<4x8x8xf32>
    %26 = arith.truncf %25 : vector<4x8x8xf32> to vector<4x8x8xbf16>
    "tpu.trace_start"() <{level = 10 : i32, message = "hqk,hkd->hqd"}> : () -> ()
    %cst_5 = arith.constant dense<0.000000e+00> : vector<4x8x8xf32>
    %27 = tpu.matmul %26, %14, %cst_5 {dimension_numbers = #tpu.dot_dimension_numbers<[2], [1], [1], [2], [0, 0, 0, 1, 1, 2], [0], [0]>} : vector<4x8x8xbf16>, vector<4x8x8xbf16>, vector<4x8x8xf32> -> vector<4x8x8xf32>
    "tpu.trace_stop"() : () -> ()
    %28 = tpu.transpose %27, [1, 0, 2] : vector<4x8x8xf32> -> vector<8x4x8xf32>
    %29 = vector.shape_cast %28 : vector<8x4x8xf32> to vector<8x32xf32>
    %30 = arith.truncf %29 : vector<8x32xf32> to vector<8x32xbf16>
    %c0_6 = arith.constant 0 : index
    %c0_7 = arith.constant 0 : index
    %31 = vector.load %arg6[%c0_6, %c0_7] : memref<32x32xbf16, #tpu.memory_space<vmem>>, vector<32x32xbf16>
    %cst_8 = arith.constant dense<0.000000e+00> : vector<8x32xf32>
    %32 = tpu.matmul %30, %31, %cst_8 {dimension_numbers = #tpu.dot_dimension_numbers<[1], [0], [0], [1], [0, 0, 1, 1], [], []>} : vector<8x32xbf16>, vector<32x32xbf16>, vector<8x32xf32> -> vector<8x32xf32>
    %c0_9 = arith.constant 0 : index
    %33 = arith.index_cast %4 : i32 to index
    %c0_10 = arith.constant 0 : index
    %34 = vector.load %arg2[%c0_9, %33, %c0_10] : memref<1x8x32xf32, #tpu.memory_space<vmem>>, vector<1x8x32xf32>
    %35 = vector.shape_cast %34 : vector<1x8x32xf32> to vector<8x32xf32>
    %36 = arith.addf %35, %32 : vector<8x32xf32>
    %c0_11 = arith.constant 0 : index
    %c0_12 = arith.constant 0 : index
    %37 = vector.load %arg7[%c0_11, %c0_12] : memref<1x32xf32, #tpu.memory_space<vmem>>, vector<1x32xf32>
    %38 = vector.broadcast %37 : vector<1x32xf32> to vector<8x32xf32>
    %39 = arith.addf %36, %38 : vector<8x32xf32>
    %c0_13 = arith.constant 0 : index
    %c0_14 = arith.constant 0 : index
    %c0_15 = arith.constant 0 : index
    %40 = vector.load %arg8[%c0_13, %c0_14, %c0_15] : memref<1x8x32xf32, #tpu.memory_space<vmem>>, vector<1x8x32xf32>
    %41 = vector.shape_cast %40 : vector<1x8x32xf32> to vector<8x32xf32>
    %42 = vector.shape_cast %39 : vector<8x32xf32> to vector<1x8x32xf32>
    tpu.vector_store %arg8[%c0_13, %c0_14, %c0_15], %42 {strides = array<i32>} : memref<1x8x32xf32, #tpu.memory_space<vmem>>, vector<1x8x32xf32>,
    return
  }
  func.func @transform_0(%arg0: i32, %arg1: i32) -> (i32, i32, i32) {
    %c0_i32 = arith.constant 0 : i32
    %c0_i32_0 = arith.constant 0 : i32
    %c0_i32_1 = arith.constant 0 : i32
    return %arg0, %c0_i32, %c0_i32_0 : i32, i32, i32
  }
  func.func @transform_1(%arg0: i32, %arg1: i32) -> (i32, i32) {
    %c0_i32 = arith.constant 0 : i32
    %c0_i32_0 = arith.constant 0 : i32
    %c0_i32_1 = arith.constant 0 : i32
    return %c0_i32, %c0_i32_0 : i32, i32
  }
  func.func @transform_2(%arg0: i32, %arg1: i32) -> (i32, i32) {
    %c0_i32 = arith.constant 0 : i32
    %c0_i32_0 = arith.constant 0 : i32
    %c0_i32_1 = arith.constant 0 : i32
    return %c0_i32, %c0_i32_0 : i32, i32
  }
  func.func @transform_3(%arg0: i32, %arg1: i32) -> (i32, i32) {
    %c0_i32 = arith.constant 0 : i32
    %c0_i32_0 = arith.constant 0 : i32
    %c0_i32_1 = arith.constant 0 : i32
    return %c0_i32, %c0_i32_0 : i32, i32
  }
  func.func @transform_4(%arg0: i32, %arg1: i32) -> (i32, i32) {
    %c0_i32 = arith.constant 0 : i32
    %c0_i32_0 = arith.constant 0 : i32
    %c0_i32_1 = arith.constant 0 : i32
    return %c0_i32, %c0_i32_0 : i32, i32
  }
  func.func @transform_5(%arg0: i32, %arg1: i32) -> (i32, i32) {
    %c0_i32 = arith.constant 0 : i32
    %c0_i32_0 = arith.constant 0 : i32
    %c0_i32_1 = arith.constant 0 : i32
    return %c0_i32, %c0_i32_0 : i32, i32
  }
  func.func @transform_6(%arg0: i32, %arg1: i32) -> (i32, i32, i32) {
    %c0_i32 = arith.constant 0 : i32
    %c0_i32_0 = arith.constant 0 : i32
    return %arg0, %arg1, %c0_i32 : i32, i32, i32
  }
}

</mosaic_0001>

<bundles_post_ra>
// kernel: tpu_custom_call.1
= control target key start
LH: loop header
LB: loop body
LE: loop exit
PB: predicated region body
PF: predicated region fallthrough
CT: control target
= control target key end

     0   :  { %s2804_s0 = inlined_call_operand.hbm [shape: f32[2,8,32], index: 0, kind: input, shape index: {}]   ;;  %s2805_s1 = inlined_call_operand.hbm [shape: f32[1,32], index: 1, kind: input, shape index: {}]   ;;  %s2806_s2 = inlined_call_operand.hbm [shape: f32[1,32], index: 2, kind: input, shape index: {}]   ;;  %s2807_s3 = inlined_call_operand.hbm [shape: bf16[32,96], index: 3, kind: input, shape index: {}]   ;;  %s2808_s4 = inlined_call_operand.hbm [shape: bf16[32,32], index: 4, kind: input, shape index: {}]   ;;  %s2809_s5 = inlined_call_operand.hbm [shape: f32[1,32], index: 5, kind: input, shape index: {}]   ;;  %s2810_s6 = inlined_call_operand.hbm [shape: f32[2,8,32], index: 6, kind: output, shape index: {}]  }
   0x1   :  { %2817 = sst [smem:[#allocation20_spill]] %s2805_s1 }
   0x2   :  { %11 = vsyncpa [#allocation4], 0 }
   0x3   :  { %13 = vsyncpa [#allocation4 + $0x1], 0 }
   0x4   :  { %14 = vsyncpa [#allocation7], 0 }
   0x5   :  { %15 = vsyncpa [#allocation10], 0 }
   0x6   :  { %16 = vsyncpa [#allocation13], 0 }
   0x7   :  { %17 = vsyncpa [#allocation5], 0 }
   0x8   :  { %19 = vsyncpa [#allocation5 + $0x1], 0  ;;  %s2307_s21 = smov 0   ;;  %s2309_s22 = smov 0  }
   0x9   :  { %s2311_s23 = smov 0   ;;  %s2313_s24 = smov 0  }
   0xa   :  { %s2315_s25 = smov 0   ;;  %s2317_s26 = smov 0  }
   0xb LB: > { %s2814_s27 = sadd.s32 4294967295, %s2248_s26   ;;  %p1702_p0 = scmp.ge.s32.totalorder %s2248_s26, 1  ;;  %s2248_s26 = sphi %s2317_s26, %s25_s26   ;;  %s2244_s25 = sphi %s2315_s25, %s2840_s25   ;;  %s2240_s24 = sphi %s2313_s24, %s2839_s24   ;;  %s2236_s23 = sphi %s2311_s23, %s2838_s23   ;;  %s2232_s22 = sphi %s2309_s22, %s2837_s22   ;;  %s2228_s21 = sphi %s2307_s21, %s2836_s21  }
   0xc   : > { %p2341_p1 = scmp.eq.s32.totalorder %s2814_s27, 0  ;;  %p201_p2 = scmp.lt.s32.totalorder %s2248_s26, 3 }
   0xd   : > { %s2250_s30 = smov [#allocation6]   ;;  %s2251_s8 = smov [#allocation9]  }
   0xe   : > { %s2818_s28 = scalar_select %p2341_p1, 1, 0 }
   0xf   : > { %p2346_p3 = pnand %p1702_p0, %p201_p2  ;;  %s214_s7 = sshll.u32 %s2250_s30, 4  ;;  %s215_s7 = int_to_ptr.vmem [resolvable:$true] %s214_s7 }
  0x10   : > { %s235_s9 = sshll.u32 %s2251_s8, 4  ;;  %s2252_s11 = smov [#allocation8]   ;;  %s2359_s9 = int_to_ptr.vmem [resolvable:$true] %s235_s9 }
  0x11   : > { %s2819_s29 = scalar_select %p2346_p3, 1, 0 }
  0x12   : > { %p1858_p5 = pneg %p2346_p3  ;;  %s2361_s12 = sshll.u32 %s2252_s11, 4  ;;  %s226_s12 = int_to_ptr.vmem [resolvable:$true] %s2361_s12 }
  0x13   : > { %s2821_s1 = sld [smem:[#allocation20_spill]] }
  0x14   : > { %p2355_p6 = pnand %p1858_p5, %p2341_p1 }
  0x16   : > { %p2371_p8 = pneg %p2355_p6 }
  0x19   : > { %s1984_s15 = scalar_lea.hbm %s2821_s1, 16 }
  0x1a   : > { %p1985_p7 = scmp.ne.s32.totalorder %s2821_s1, %s1984_s15  ;;  %p1991_p11 = scmp.lt.u32.totalorder %s1984_s15, %s2821_s1 }
  0x1c   : > { %p1987_p9 = pnand %p2371_p8, %p1985_p7 }
  0x1e   : > { %p1988_p10 = pneg %p1987_p9 }
  0x20   : > { %p1993_p12 = pnand %p1991_p11, %p1988_p10 }
  0x22   : > { %1996 = shalt.err (!%p1993_p12)
}
  0x23   : > { %s1997_s30 = scalar_lea.vmem %s215_s7, 16  ;;  %s2004_s8 = scalar_lea.vmem %s215_s7, 32 }
  0x24   : > { %p1998_p13 = scmp.ne.s32.totalorder %s215_s7, %s1997_s30  ;;  %p2005_p5 = scmp.lt.s32.totalorder %s215_s7, %s215_s7 }
  0x25   : > { %p2006_p4 = scmp.lt.s32.totalorder %s2004_s8, %s1997_s30 }
  0x26   : > { %p2000_p0 = pnand %p1998_p13, %p2371_p8 }
  0x27   : > { %p2007_p3 = por %p2006_p4, %p2005_p5 }
  0x28   : > { %p2001_p2 = pneg %p2000_p0 }
  0x2a   : > { %p2008_p1 = pnand %p2007_p3, %p2001_p2 }
  0x2c   : > { %2011 = shalt.err (!%p2008_p1)
}
  0x2d   : > { %1861 = dma.hbm_to_vmem [thread:$0]  (!%p2355_p6), %s2821_s1, 16, %s215_s7, [#allocation7]  }
  0x2e   : > { %s2012_s16 = scalar_lea.hbm %s2807_s3, 256 }
  0x2f   : > { %p2013_p7 = scmp.ne.s32.totalorder %s2807_s3, %s2012_s16  ;;  %p2019_p1 = scmp.lt.u32.totalorder %s2012_s16, %s2807_s3 }
  0x31   : > { %p2015_p9 = pnand %p2013_p7, %p2371_p8 }
  0x33   : > { %p2016_p4 = pneg %p2015_p9 }
  0x35   : > { %p2021_p3 = pnand %p2019_p1, %p2016_p4 }
  0x37   : > { %2024 = shalt.err (!%p2021_p3)
}
  0x38   : > { %s2025_s7 = scalar_lea.vmem %s2359_s9, 256  ;;  %p2033_p13 = scmp.lt.s32.totalorder %s2359_s9, %s2359_s9 }
  0x39   : > { %p2026_p10 = scmp.ne.s32.totalorder %s2359_s9, %s2025_s7  ;;  %p2034_p0 = scmp.lt.s32.totalorder %s2025_s7, %s2025_s7 }
  0x3b   : > { %p2028_p11 = pnand %p2026_p10, %p2371_p8  ;;  %p2035_p2 = por %p2034_p0, %p2033_p13 }
  0x3d   : > { %p2029_p12 = pneg %p2028_p11 }
  0x3f   : > { %p2036_p5 = pnand %p2035_p2, %p2029_p12 }
  0x41   : > { %2039 = shalt.err (!%p2036_p5)
}
  0x42   : > { %s2815_s8 = smov 64   ;;  %s2254_s11 = smov 4  }
  0x43   : > { %1867 = dma.hbm_to_vmem [thread:$0]  (!%p2355_p6), %s2807_s3, 256, %s2359_s9, [#allocation10], %s2815_s8, %s2815_s8, %s2254_s11  }
  0x44   : > { %s2040_s17 = scalar_lea.hbm %s2806_s2, 16 }
  0x45   : > { %p2041_p7 = scmp.ne.s32.totalorder %s2806_s2, %s2040_s17  ;;  %p2047_p1 = scmp.lt.u32.totalorder %s2040_s17, %s2806_s2 }
  0x47   : > { %p2043_p9 = pnand %p2041_p7, %p2371_p8 }
  0x49   : > { %p2044_p4 = pneg %p2043_p9 }
  0x4b   : > { %p2049_p3 = pnand %p2047_p1, %p2044_p4 }
  0x4d   : > { %2052 = shalt.err (!%p2049_p3)
}
  0x4e   : > { %s2053_s13 = scalar_lea.vmem %s226_s12, 16  ;;  %s2060_s9 = scalar_lea.vmem %s226_s12, 32 }
  0x4f   : > { %p2054_p10 = scmp.ne.s32.totalorder %s226_s12, %s2053_s13  ;;  %p2061_p13 = scmp.lt.s32.totalorder %s226_s12, %s226_s12 }
  0x50   : > { %p2062_p0 = scmp.lt.s32.totalorder %s2060_s9, %s2053_s13 }
  0x51   : > { %p2056_p11 = pnand %p2054_p10, %p2371_p8 }
  0x52   : > { %p2063_p2 = por %p2062_p0, %p2061_p13 }
  0x53   : > { %p2057_p12 = pneg %p2056_p11 }
  0x55   : > { %p2064_p5 = pnand %p2063_p2, %p2057_p12 }
  0x57   : > { %2067 = shalt.err (!%p2064_p5)
}
  0x58   : > { %1864 = dma.hbm_to_vmem [thread:$0]  (!%p2355_p6), %s2806_s2, 16, %s226_s12, [#allocation7]  }
  0x59   : > { %s2255_s16 = smov [#allocation11]   ;;  %s2256_s19 = smov [#allocation12]  }
  0x5a   : > { %s248_s17 = sshll.u32 %s2255_s16, 4  ;;  %s262_s20 = sshll.u32 %s2256_s19, 4  ;;  %s249_s17 = int_to_ptr.vmem [resolvable:$true] %s248_s17  ;;  %s263_s20 = int_to_ptr.vmem [resolvable:$true] %s262_s20 }
  0x5b   : > { %s2068_s27 = scalar_lea.hbm %s2808_s4, 256 }
  0x5c   : > { %p2069_p7 = scmp.ne.s32.totalorder %s2808_s4, %s2068_s27  ;;  %p2075_p1 = scmp.lt.u32.totalorder %s2068_s27, %s2808_s4 }
  0x5e   : > { %p2071_p9 = pnand %p2069_p7, %p2371_p8 }
  0x60   : > { %p2072_p4 = pneg %p2071_p9 }
  0x62   : > { %p2077_p3 = pnand %p2075_p1, %p2072_p4 }
  0x64   : > { %2080 = shalt.err (!%p2077_p3)
}
  0x65   : > { %s2081_s12 = scalar_lea.vmem %s249_s17, 256  ;;  %p2089_p13 = scmp.lt.s32.totalorder %s249_s17, %s249_s17 }
  0x66   : > { %p2082_p10 = scmp.ne.s32.totalorder %s249_s17, %s2081_s12  ;;  %p2090_p0 = scmp.lt.s32.totalorder %s2081_s12, %s2081_s12 }
  0x68   : > { %p2084_p11 = pnand %p2082_p10, %p2371_p8  ;;  %p2091_p2 = por %p2090_p0, %p2089_p13 }
  0x6a   : > { %p2085_p12 = pneg %p2084_p11 }
  0x6c   : > { %p2092_p5 = pnand %p2091_p2, %p2085_p12 }
  0x6e   : > { %2095 = shalt.err (!%p2092_p5)
}
  0x6f   : > { %s2823_s15 = smov 64   ;;  %s2096_s30 = scalar_lea.hbm %s2809_s5, 16 }
  0x70   : > { %1870 = dma.hbm_to_vmem [thread:$0]  (!%p2355_p6), %s2808_s4, 256, %s249_s17, [#allocation10], %s2823_s15, %s2823_s15, %s2254_s11  }
  0x71   : > { %p2097_p7 = scmp.ne.s32.totalorder %s2809_s5, %s2096_s30  ;;  %p2103_p1 = scmp.lt.u32.totalorder %s2096_s30, %s2809_s5 }
  0x73   : > { %p2099_p9 = pnand %p2097_p7, %p2371_p8 }
  0x75   : > { %p2100_p4 = pneg %p2099_p9 }
  0x77   : > { %p2105_p3 = pnand %p2103_p1, %p2100_p4 }
  0x79   : > { %2108 = shalt.err (!%p2105_p3)
}
  0x7a   : > { %s2109_s12 = scalar_lea.vmem %s263_s20, 16  ;;  %s2116_s11 = scalar_lea.vmem %s263_s20, 32 }
  0x7b   : > { %p2110_p10 = scmp.ne.s32.totalorder %s263_s20, %s2109_s12  ;;  %p2117_p13 = scmp.lt.s32.totalorder %s263_s20, %s263_s20 }
  0x7c   : > { %p2118_p0 = scmp.lt.s32.totalorder %s2116_s11, %s2109_s12 }
  0x7d   : > { %p2112_p11 = pnand %p2110_p10, %p2371_p8 }
  0x7e   : > { %p2119_p2 = por %p2118_p0, %p2117_p13 }
  0x7f   : > { %p2113_p12 = pneg %p2112_p11 }
  0x81   : > { %p2120_p5 = pnand %p2119_p2, %p2113_p12 }
  0x83   : > { %2123 = shalt.err (!%p2120_p5)
}
  0x84   : > { %1873 = dma.hbm_to_vmem [thread:$0]  (!%p2355_p6), %s2809_s5, 16, %s263_s20, [#allocation13]  }
  0x85   : > { %s1701_s18 = sadd.s32 4294967294, %s2248_s26   ;;  %s37_s8 = sadd.s32 1, %s2244_s25 }
  0x86   : > { %s44_s10 = sadd.s32 1, %s2236_s23  ;;  %p39_p8 = scmp.ge.s32.totalorder %s37_s8, 2 }
  0x87   : > { %p51_p7 = scmp.ne.s32.totalorder %s2236_s23, %s2232_s22  ;;  %p52_p9 = scmp.eq.s32.totalorder %s2248_s26, 0 }
  0x88   : > { %p57_p4 = scmp.ne.s32.totalorder %s2232_s22, %s2228_s21  ;;  %s2842_s8 = smov (%p39_p8, %s37_s8), 0 }
  0x89   : > { %p2481_p1 = por %p52_p9, %p51_p7  ;;  %p2825_p3 = scmp.ne.s32.totalorder %s2818_s28, 0 }
  0x8a   : > { %s41_s16 = ssub.s32 %s2244_s25, %s2842_s8  ;;  %s2827_s19 = sadd.s32 4294967295, %s2248_s26  }
  0x8b   : > { %p2487_p6 = por %p2825_p3, %p57_p4  ;;  %p188_p10 = scmp.eq.s32.totalorder %s2827_s19, 1 }
  0x8c   : > { %p42_p11 = scmp.eq.s32.totalorder %s41_s16, 0  ;;  %p194_p12 = scmp.eq.s32.totalorder %s1701_s18, 1 }
  0x8d   : > { %p2495_p13 = por %p188_p10, %p51_p7  ;;  %p1887_p0 = scmp.lt.s32.totalorder %s2248_s26, 2 }
  0x8e   : > { %s2501_s7 = scalar_select %p42_p11, %s2236_s23, %s44_s10  }
  0x8f   : > { %s2828_s30 = scalar_select %p2495_p13, 1, 0 }
  0x90   : > { %p2503_p2 = por %p194_p12, %p57_p4  ;;  %s273_s9 = sand.u32 1, %s2236_s23  }
  0x91   : > { %s1709_s14 = sshll.u32 %s273_s9, 3  ;;  %s1710_s12 = sshll.u32 %s2244_s25, 7 }
  0x92   : > { %s2829_s13 = scalar_select %p2503_p2, 1, 0 }
  0x93   : > { %s2512_s15 = scalar_lea.hbm %s2804_s0, %s1710_s12  ;;  %s277_s18 = scalar_lea.vmem [#allocation3], %s1709_s14 }
  0x94   : > { %s284_s16 = sshll.u32 %s277_s18, 4  ;;  %p2518_p5 = pnand %p1887_p0, %p2481_p1  ;;  %s2514_s16 = int_to_ptr.vmem [resolvable:$true] %s284_s16 }
  0x95   : > { %s274_s19 = scalar_lea.sflag [#allocation4], %s273_s9  ;;  %s2124_s1 = scalar_lea.hbm %s2512_s15, 128 }
  0x96   : > { %p2125_p8 = scmp.ne.s32.totalorder %s2512_s15, %s2124_s1  ;;  %p2126_p7 = pneg %p2518_p5 }
  0x97   : > { %s2129_s11 = scalar_lea.hbm %s2804_s0, 256  ;;  %p2130_p1 = scmp.lt.u32.totalorder %s2512_s15, %s2804_s0 }
  0x98   : > { %p2127_p9 = pnand %p2126_p7, %p2125_p8  ;;  %p2131_p3 = scmp.lt.u32.totalorder %s2129_s11, %s2124_s1 }
  0x99   : > { %p2133_p11 = scmp.lt.u32.totalorder %s2124_s1, %s2512_s15 }
  0x9a   : > { %p2128_p4 = pneg %p2127_p9  ;;  %p2132_p10 = por %p2131_p3, %p2130_p1 }
  0x9c   : > { %p2134_p12 = por %p2133_p11, %p2132_p10 }
  0x9e   : > { %p2135_p0 = pnand %p2134_p12, %p2128_p4 }
  0xa0   : > { %2138 = shalt.err (!%p2135_p0)
}
  0xa1   : > { %s2139_s9 = scalar_lea.vmem %s2514_s16, 128  ;;  %s2257_s18 = smov [#allocation3]  }
  0xa2   : > { %p2140_p8 = scmp.ne.s32.totalorder %s2514_s16, %s2139_s9  ;;  %s2144_s14 = sshll.u32 %s2257_s18, 4  ;;  %s2145_s14 = int_to_ptr.vmem [resolvable:$false] %s2144_s14 }
  0xa3   : > { %s2146_s12 = scalar_lea.vmem %s2145_s14, 256  ;;  %p2147_p13 = scmp.lt.s32.totalorder %s2514_s16, %s2145_s14 }
  0xa4   : > { %p2142_p9 = pnand %p2140_p8, %p2126_p7  ;;  %p2148_p1 = scmp.lt.s32.totalorder %s2146_s12, %s2139_s9 }
  0xa6   : > { %p2143_p2 = pneg %p2142_p9  ;;  %p2149_p3 = por %p2148_p1, %p2147_p13 }
  0xa8   : > { %p2150_p10 = pnand %p2149_p3, %p2143_p2 }
  0xaa   : > { %2153 = shalt.err (!%p2150_p10)
}
  0xab   : > { %1877 = dma.hbm_to_vmem [thread:$0]  (!%p2518_p5), %s2512_s15, 128, %s2514_s16, %s274_s19  }
  0xac   : > { %p2831_p4 = scmp.ne.s32.totalorder %s2819_s29, 0 }
  0xad   : > { %s2550_s1 = sand.u32 (!%p2831_p4), 1, %s2232_s22  }
  0xae   : > { %293 = sbr.rel (%p2831_p4) target bundleno = 2159 (0x86f), region = 44  ;;  %s1712_s11 = sshll.u32 (!%p2831_p4), %s2550_s1, 3 }
  0xaf   : > { %s296_s27 = scalar_lea.sflag (!%p2831_p4), [#allocation4], %s2550_s1  ;;  %s299_s17 = scalar_lea.vmem (!%p2831_p4), [#allocation3], %s1712_s11 }
  0xb5   : > { %2207 = dma.done.wait (%p2487_p6), %s296_s27, 128  }
  0xb6   : > { %2209 = vsyncadd (%p2487_p6), %s296_s27, 4294967168  ;;  %p2832_p13 = scmp.ne.s32.totalorder %s2818_s28, 0 }
  0xb8   : > { %2211 = dma.done.wait (%p2832_p13), [#allocation7], 32  }
  0xb9   : > { %2213 = vsyncadd (%p2832_p13), [#allocation7], 4294967264 }
  0xba   : > { %2215 = dma.done.wait (%p2832_p13), [#allocation10], 512  }
  0xbb   : > { %2217 = vsyncadd (%p2832_p13), [#allocation10], 4294966784 }
  0xbc   : > { %2219 = dma.done.wait (%p2832_p13), [#allocation13], 16  }
  0xbd   : > { %2221 = vsyncadd (%p2832_p13), [#allocation13], 4294967280  ;;  %vm356_vm0 = vcmask 261120   ;;  %v2572_v0 = vld [vmem:[%s299_s17] sm:$0xff]  ;;  %v1962_v7 = vld [vmem:[#allocation9] sm:$0xff]   ;;  %v2258_v8 = vmov 0.0   ;;  %v477_v33 = vlaneseq }
  0xbe   : > { %v357_v1 = vsel %vm356_vm0, %v2572_v0, 0.0  ;;  %1770 = vmatprep.subr.bf16.mxu0 %v2258_v8  ;;  %vm2259_vm1 = vmmov 0   ;;  %v1963_v9 = vld [vmem:[#allocation9 + $0x8] sm:$0xff]   ;;  %1778 = vmatprep.subr.bf16.mxu1 %v2258_v8  ;;  %v1719_v14 = vld [vmem:[#allocation6] ss:$0 sm:$0xff]  ;;  %vm445_vm2 = vcmask 781312  }
  0xbf   : > { %358 = vadd.xlane.f32.xlu0 %v357_v1  ;;  %1774 = vmatprep.mubr.msk.bf16.mxu0 %vm2259_vm1, %v2258_v8  ;;  %v1720_v16 = vld [vmem:[#allocation8] ss:$0 sm:$0xff]  ;;  %s2260_s28 = smov 104   ;;  %s2261_s29 = smov 120   ;;  %v2264_v31 = vmov 1983009808  }
  0xc0   : > { %1771 = vmatpush3.bf16.msra.mxu0 %v1962_v7  ;;  %1780 = vmatprep.mubr.msk.bf16.mxu1 %vm2259_vm1, %v2258_v8  ;;  %s2262_s20 = smov 112   ;;  %s2263_s15 = smov 96   ;;  %v475_v32 = vunpack.c.l.s4 %v2264_v31  ;;  %v478_v36 = vshrl.u32 %v477_v33, 7  ;;  %v2265_v37 = vmov 1934713408   ;;  %vm910_vm3 = vcmask 64512  }
  0xc1   : > { %1772 = vmatprep.subr.bf16.mxu0 %v2258_v8  ;;  %v492_v38 = vunpack.c.l.s4 %v2265_v37  ;;  %s2267_s16 = smov 64   ;;  %vm1146_vm4 = vcmask 1043456   ;;  %s2268_s10 = smov 16   ;;  %vm1477_vm5 = vcmask 130048   ;;  %vm1479_vm6 = vcmask 195584  }
  0xc2   : > { %v476_v35 = vunpack.c.0.s8 %v475_v32  ;;  %s2269_s19 = smov 8   ;;  %s2270_s9 = smov 24  }
  0xc3   : > { %v493_v44 = vunpack.c.0.s8 %v492_v38  ;;  %s1745_s18 = sshll.u32 %s2240_s24, 7  ;;  %s347_s14 = scalar_lea.vmem [#allocation14], %s1712_s11 }
  0xc4   : > { %1773 = vmatpush3.bf16.msra.mxu0 %v1963_v9  ;;  %v2609_v42 = vsub.s32 %v476_v35, %v478_v36  ;;  %s1569_s12 = sshll.u32 %s347_s14, 4  ;;  %s1555_s24 = scalar_lea.sflag [#allocation5], %s2550_s1  ;;  %s2756_s12 = int_to_ptr.vmem [resolvable:$true] %s1569_s12 }
  0xc5   : > { %1784 = vmatprep.subr.bf16.mxu0 %v2258_v8  ;;  %v2612_v51 = vsub.s32 %v493_v44, %v478_v36  ;;  %s2154_s11 = scalar_lea.vmem %s2756_s12, 128  ;;  %p2833_p2 = scmp.ne.s32.totalorder %s2828_s30, 0 }
  0xc6   : > { %p2155_p6 = scmp.ne.s32.totalorder %s2756_s12, %s2154_s11 }
  0xc8   : > { %p2156_p5 = pnand %p2155_p6, %p2833_p2 }
  0xca   : > { %p2157_p7 = pneg %p2156_p5 }
 0x14c   : > { %v359_v2 = vpop.xlane.xlu0 %358 }
 0x14d   : > { %v360_v3 = vmul.f32 0.03125, %v359_v2 }
 0x14f   : > { %v361_v4 = vsub.f32 %v2572_v0, %v360_v3 }
 0x151   : > { %v362_v5 = vmul.f32 %v361_v4, %v361_v4 }
 0x153   : > { %v363_v6 = vsel %vm356_vm0, %v362_v5, 0.0 }
 0x154   : > { %364 = vadd.xlane.f32.xlu0 %v363_v6 }
 0x1e1   : > { %v365_v10 = vpop.xlane.xlu0 %364 }
 0x1e2   : > { %v366_v11 = vmul.f32 0.03125, %v365_v10 }
 0x1e4   : > { %v367_v12 = vadd.f32 1e-05, %v366_v11 }
 0x1e6   : > { %1966 = vrsqrt.f32 %v367_v12 }
 0x1f0   : > { %v1967_v13 = vpop.eup %1966 }
 0x1f1   : > { %v369_v15 = vmul.f32 %v1967_v13, %v361_v4 }
 0x1f3   : > { %v376_v17 = vmul.f32 %v1719_v14, %v369_v15 }
 0x1f5   : > { %v383_v18 = vadd.f32 %v1720_v16, %v376_v17 }
 0x1f7   : > { %v384_v19 = vpack.c.bf16 %v383_v18, %v383_v18 }
 0x1f9   : > { %1775 = vmatmul.mubr.msk.bf16.vlgmr.msra.gmra.mrb[0].mxu0 %vm356_vm0, %v384_v19 }
 0x1fa   : > { %1786 = vmatprep.mubr.msk.bf16.mxu0 %vm2259_vm1, %v2258_v8 }
 0x2cc   : > { %v438_v20 = vpop.f32.mrb[0].mxu0 }
 0x2cd   : > { %v444_v21 = vpack.c.bf16 %v438_v20, %v438_v20  ;;  %v1776_v22 = vpop.f32.mrb[1].mxu0 }
 0x2ce   : > { %v441_v23 = vpop.f32.mrb[2].mxu0 }
 0x2cf   : > { %446 = vst.msk [vmem:[#allocation2] sm:$0xf] %vm445_vm2, %v444_v21  ;;  %v1777_v24 = vpop.f32.mrb[3].mxu0 }
 0x2d6   : > { %v2589_v25 = vld [vmem:[#allocation2] sm:$0xf] }
 0x2d7   : > { %608 = vrot.lane.b32.xlu0 %v2589_v25, %s2260_s28  ;;  %604 = vrot.lane.b32.xlu1 %v2589_v25, %s2261_s29  ;;  %v2593_v26 = vld [vmem:[#allocation2] sm:$0xf] }
 0x2d8   : > { %v464_v3 = vshrl.u32 %v2593_v26, 16 }
 0x2db   : > { %606 = vrot.lane.b32.xlu1 %v2589_v25, %s2262_s20  ;;  %459 = vrot.lane.b32.xlu0 %v2593_v26, %s2260_s28  ;;  %s2754_s28 = scalar_lea.hbm %s2810_s6, %s1745_s18 }
 0x2df   : > { %610 = vrot.lane.b32.xlu1 %v2589_v25, %s2263_s15 }
 0x349   : > { %v2598_v27 = vpop.permute.xlu1 %604  ;;  %v2604_v29 = vpop.permute.xlu0 %608 }
 0x34a   : > { %612 = vrot.lane.b32.xlu1 %v2598_v27, %s2263_s15 }
 0x34d   : > { %v2601_v28 = vpop.permute.xlu1 %606  ;;  %v460_v60 = vpop.permute.xlu0 %459 }
 0x34e   : > { %614 = vrot.lane.b32.xlu1 %v2601_v28, %s2263_s15  ;;  %v471_v10 = vshrl.u32 %v460_v60, 16 }
 0x351   : > { %v611_v30 = vpop.permute.xlu1 %610 }
 0x352   : > { %616 = vrot.lane.b32.xlu1 %v2604_v29, %s2263_s15  ;;  %v621_v41 = vshrl.u32 %v611_v30, 16 }
 0x356   : > { %455 = vrot.lane.b32.xlu1 %v2593_v26, %s2261_s29  ;;  %s2271_s29 = smov [#allocation14]  }
 0x35a   : > { %457 = vrot.lane.b32.xlu1 %v2593_v26, %s2262_s20  ;;  %s2158_s20 = sshll.u32 %s2271_s29, 4  ;;  %s2159_s20 = int_to_ptr.vmem [resolvable:$false] %s2158_s20 }
 0x35b   : > { %s2160_s15 = scalar_lea.vmem %s2159_s20, 256  ;;  %p2161_p11 = scmp.lt.s32.totalorder %s2756_s12, %s2159_s20 }
 0x35c   : > { %p2162_p12 = scmp.lt.s32.totalorder %s2160_s15, %s2154_s11 }
 0x35e   : > { %p2163_p0 = por %p2162_p12, %p2161_p11 }
 0x360   : > { %p2164_p8 = pnand %p2163_p0, %p2157_p7 }
 0x3bc   : > { %v613_v34 = vpop.permute.xlu1 %612 }
 0x3bd   : > { %v622_v40 = vshrl.u32 %v613_v34, 16  ;;  %v620_v43 = vpack.i.b16 %v613_v34, %v611_v30 }
 0x3bf   : > { %v623_v46 = vpack.i.b16 %v622_v40, %v621_v41  ;;  %v637_v50 = vrot.slane %v620_v43, %v2609_v42 }
 0x3c0   : > { %v615_v39 = vpop.permute.xlu1 %614 }
 0x3c1   : > { %v627_v47 = vshrl.u32 %v615_v39, 16  ;;  %v671_v55 = vrot.slane %v623_v46, %v2609_v42 }
 0x3c4   : > { %v617_v45 = vpop.permute.xlu1 %616 }
 0x3c5   : > { %v626_v48 = vpack.i.b16 %v617_v45, %v615_v39  ;;  %v628_v49 = vshrl.u32 %v617_v45, 16 }
 0x3c7   : > { %v629_v52 = vpack.i.b16 %v628_v49, %v627_v47  ;;  %v645_v53 = vrot.slane %v626_v48, %v2609_v42  ;;  %v2266_v47 = vmov 0  }
 0x3c8   : > { %v456_v54 = vpop.permute.xlu1 %455 }
 0x3c9   : > { %v646_v56 = vcombine.low %v637_v50, %v645_v53  ;;  %v647_v57 = vcombine.high %v637_v50, %v645_v53  ;;  %v679_v58 = vrot.slane %v629_v52, %v2609_v42  ;;  %v465_v59 = vshrl.u32 %v456_v54, 16 }
 0x3ca   : > { %v463_v2 = vpack.i.b16 %v456_v54, %v2593_v26 }
 0x3cb   : > { %v654_v61 = vrot.slane %v646_v56, %v2612_v51  ;;  %v661_v62 = vrot.slane %v647_v57, %v2612_v51  ;;  %v680_v63 = vcombine.low %v671_v55, %v679_v58  ;;  %v681_v1 = vcombine.high %v671_v55, %v679_v58 }
 0x3cc   : > { %v458_v4 = vpop.permute.xlu1 %457  ;;  %v466_v11 = vpack.i.b16 %v465_v59, %v464_v3  ;;  %v480_v18 = vrot.slane %v463_v2, %v2609_v42 }
 0x3cd   : > { %v688_v5 = vrot.slane %v680_v63, %v2612_v51  ;;  %v695_v6 = vrot.slane %v681_v1, %v2612_v51  ;;  %v698_v7 = vcombine.low %v654_v61, %v661_v62  ;;  %v1726_v9 = vcombine.high %v654_v61, %v661_v62 }
 0x3ce   : > { %v469_v12 = vpack.i.b16 %v460_v60, %v458_v4  ;;  %v470_v13 = vshrl.u32 %v458_v4, 16  ;;  %v514_v24 = vrot.slane %v466_v11, %v2609_v42 }
 0x3cf   : > { %v723_v14 = vcombine.low %v688_v5, %v695_v6  ;;  %v1727_v15 = vcombine.high %v688_v5, %v695_v6  ;;  %v705_v16 = vrot.slane %v698_v7, %v2609_v42  ;;  %v713_v17 = vrot.slane %v1726_v9, %v2609_v42 }
 0x3d0   : > { %v472_v19 = vpack.i.b16 %v471_v10, %v470_v13  ;;  %v488_v20 = vrot.slane %v469_v12, %v2609_v42 }
 0x3d1   : > { %v714_v21 = vcombine.low %v705_v16, %v713_v17  ;;  %v730_v22 = vrot.slane %v723_v14, %v2609_v42  ;;  %v738_v23 = vrot.slane %v1727_v15, %v2609_v42 }
 0x3d2   : > { %v489_v26 = vcombine.low %v480_v18, %v488_v20  ;;  %v490_v30 = vcombine.high %v480_v18, %v488_v20  ;;  %v522_v31 = vrot.slane %v472_v19, %v2609_v42 }
 0x3d3   : > { %v721_v32 = vrot.slane %v714_v21, %v2612_v51  ;;  %v739_v33 = vcombine.low %v730_v22, %v738_v23 }
 0x3d4   : > { %v497_v34 = vrot.slane %v489_v26, %v2612_v51  ;;  %v504_v35 = vrot.slane %v490_v30, %v2612_v51  ;;  %v523_v36 = vcombine.low %v514_v24, %v522_v31  ;;  %v524_v37 = vcombine.high %v514_v24, %v522_v31 }
 0x3d5   : > { %v746_v38 = vrot.slane %v739_v33, %v2612_v51  ;;  %v751_v45 = vshrl.u32 %v721_v32, 16  ;;  %v722_v59 = vcombine.high %v721_v32, %v2266_v47 }
 0x3d6   : > { %v531_v39 = vrot.slane %v523_v36, %v2612_v51  ;;  %v538_v40 = vrot.slane %v524_v37, %v2612_v51  ;;  %v541_v41 = vcombine.low %v497_v34, %v504_v35  ;;  %v1724_v43 = vcombine.high %v497_v34, %v504_v35 }
 0x3d7   : > { %v750_v44 = vpack.i.b16 %v746_v38, %v721_v32  ;;  %v752_v46 = vshrl.u32 %v746_v38, 16  ;;  %v747_v48 = vcombine.high %v746_v38, %v2266_v47  ;;  %v757_v3 = vshrl.u32 %v722_v59, 16 }
 0x3d8   : > { %v548_v49 = vrot.slane %v541_v41, %v2609_v42  ;;  %v556_v50 = vrot.slane %v1724_v43, %v2609_v42  ;;  %v566_v52 = vcombine.low %v531_v39, %v538_v40  ;;  %v1725_v53 = vcombine.high %v531_v39, %v538_v40 }
 0x3d9   : > { %v915_v54 = vsel %vm910_vm3, %v750_v44, 0  ;;  %v753_v55 = vpack.i.b16 %v752_v46, %v751_v45  ;;  %v758_v63 = vshrl.u32 %v747_v48, 16  ;;  %v756_v2 = vpack.i.b16 %v747_v48, %v722_v59 }
 0x3da   : > { %v557_v56 = vcombine.low %v548_v49, %v556_v50  ;;  %v573_v57 = vrot.slane %v566_v52, %v2609_v42  ;;  %v581_v58 = vrot.slane %v1725_v53, %v2609_v42  ;;  %1779 = vmatpush3.bf16.xpose.msra.mxu1 %v915_v54 }
 0x3db   : > { %v961_v60 = vsel %vm910_vm3, %v753_v55, 0  ;;  %1790 = vmatprep.subr.bf16.mxu1 %v2258_v8  ;;  %v759_v7 = vpack.i.b16 %v758_v63, %v757_v3  ;;  %v1007_v9 = vsel %vm910_vm3, %v756_v2, 0 }
 0x3dc   : > { %1785 = vmatpush3.bf16.xpose.msra.mxu0 %v961_v60  ;;  %v564_v61 = vrot.slane %v557_v56, %v2612_v51  ;;  %v582_v62 = vcombine.low %v573_v57, %v581_v58 }
 0x3dd   : > { %1796 = vmatprep.subr.bf16.mxu0 %v2258_v8  ;;  %v1053_v12 = vsel %vm910_vm3, %v759_v7, 0 }
 0x3de   : > { %v589_v1 = vrot.slane %v582_v62, %v2612_v51  ;;  %v594_v5 = vshrl.u32 %v564_v61, 16  ;;  %v565_v13 = vcombine.high %v564_v61, %v2266_v47 }
 0x3e0   : > { %v593_v4 = vpack.i.b16 %v589_v1, %v564_v61  ;;  %v595_v6 = vshrl.u32 %v589_v1, 16  ;;  %v590_v11 = vcombine.high %v589_v1, %v2266_v47  ;;  %v600_v16 = vshrl.u32 %v565_v13, 16 }
 0x3e2   : > { %1781 = vmatmul.mubr.msk.bf16.vlgmr.msra.gmra.mrb[0].mxu1 %vm910_vm3, %v593_v4  ;;  %v596_v10 = vpack.i.b16 %v595_v6, %v594_v5  ;;  %v601_v14 = vshrl.u32 %v590_v11, 16  ;;  %v599_v15 = vpack.i.b16 %v590_v11, %v565_v13 }
 0x3e3   : > { %1791 = vmatpush3.bf16.xpose.msra.mxu1 %v1007_v9  ;;  %1792 = vmatprep.mubr.msk.bf16.mxu1 %vm2259_vm1, %v2258_v8 }
 0x3e4   : > { %1787 = vmatmul.mubr.msk.bf16.vlgmr.msra.gmra.mrb[4].mxu0 %vm910_vm3, %v596_v10  ;;  %1802 = vmatprep.subr.bf16.mxu1 %v2258_v8  ;;  %v602_v17 = vpack.i.b16 %v601_v14, %v600_v16 }
 0x3e5   : > { %1797 = vmatpush3.bf16.xpose.msra.mxu0 %v1053_v12  ;;  %1798 = vmatprep.mubr.msk.bf16.mxu0 %vm2259_vm1, %v2258_v8 }
 0x3e6   : > { %1808 = vmatprep.subr.bf16.mxu0 %v2258_v8 }
 0x3ea   : > { %1793 = vmatmul.mubr.msk.bf16.vlgmr.msra.gmra.mrb[4].mxu1 %vm910_vm3, %v599_v15 }
 0x3eb   : > { %1804 = vmatprep.mubr.msk.bf16.mxu1 %vm2259_vm1, %v2258_v8 }
 0x3ec   : > { %1799 = vmatmul.mubr.msk.bf16.vlgmr.msra.gmra.mrb[8].mxu0 %vm910_vm3, %v602_v17 }
 0x3ed   : > { %1810 = vmatprep.mubr.msk.bf16.mxu0 %vm2259_vm1, %v2258_v8 }
 0x4b5   : > { %v951_v18 = vpop.f32.mrb[0].mxu1 }
 0x4b6   : > { %v1782_v19 = vpop.f32.mrb[1].mxu1  ;;  %v1095_v20 = vsel %vm910_vm3, %v951_v18, -inf }
 0x4b7   : > { %1096 = vmax.xlane.f32.xlu1 %v1095_v20  ;;  %v954_v21 = vpop.f32.mrb[2].mxu1  ;;  %v997_v22 = vpop.f32.mrb[4].mxu0 }
 0x4b8   : > { %v1783_v23 = vpop.f32.mrb[3].mxu1  ;;  %v1788_v24 = vpop.f32.mrb[5].mxu0  ;;  %v1098_v26 = vsel %vm910_vm3, %v997_v22, -inf }
 0x4b9   : > { %1099 = vmax.xlane.f32.xlu0 %v1098_v26  ;;  %v1000_v30 = vpop.f32.mrb[6].mxu0 }
 0x4ba   : > { %v1789_v31 = vpop.f32.mrb[7].mxu0 }
 0x4bd   : > { %v1043_v32 = vpop.f32.mrb[4].mxu1 }
 0x4be   : > { %v1794_v33 = vpop.f32.mrb[5].mxu1  ;;  %v1101_v34 = vsel %vm910_vm3, %v1043_v32, -inf }
 0x4bf   : > { %v1046_v35 = vpop.f32.mrb[6].mxu1  ;;  %1102 = vmax.xlane.f32.xlu0 %v1101_v34  ;;  %v1089_v36 = vpop.f32.mrb[8].mxu0 }
 0x4c0   : > { %v1795_v37 = vpop.f32.mrb[7].mxu1  ;;  %v1800_v38 = vpop.f32.mrb[9].mxu0  ;;  %v1104_v39 = vsel %vm910_vm3, %v1089_v36, -inf }
 0x4c1   : > { %1105 = vmax.xlane.f32.xlu1 %v1104_v39  ;;  %v1092_v40 = vpop.f32.mrb[10].mxu0 }
 0x4c2   : > { %v1801_v41 = vpop.f32.mrb[11].mxu0 }
 0x4d2   : > { %762 = vrot.lane.b32.xlu1 %v2598_v27, %s2267_s16 }
 0x4d5   : > { %760 = vrot.lane.b32.xlu0 %v2589_v25, %s2267_s16 }
 0x544   : > { %v1097_v43 = vpop.xlane.xlu1 %1096 }
 0x545   : > { %v1107_v44 = vsub.f32 %v951_v18, %v1097_v43 }
 0x546   : > { %v1100_v45 = vpop.xlane.xlu0 %1099 }
 0x547   : > { %v1111_v46 = vmul.f32 1.442695, %v1107_v44  ;;  %v1108_v48 = vsub.f32 %v997_v22, %v1100_v45 }
 0x549   : > { %1968 = vpow2.f32 %v1111_v46  ;;  %v1113_v49 = vmul.f32 1.442695, %v1108_v48 }
 0x54b   : > { %1970 = vpow2.f32 %v1113_v49 }
 0x54c   : > { %v1103_v54 = vpop.xlane.xlu0 %1102 }
 0x54d   : > { %v1109_v56 = vsub.f32 %v1043_v32, %v1103_v54 }
 0x54e   : > { %v1106_v25 = vpop.xlane.xlu1 %1105 }
 0x54f   : > { %v1110_v55 = vsub.f32 %v1089_v36, %v1106_v25  ;;  %v1115_v58 = vmul.f32 1.442695, %v1109_v56 }
 0x551   : > { %v1117_v57 = vmul.f32 1.442695, %v1110_v55 }
 0x552   : > { %v763_v62 = vpop.permute.xlu1 %762 }
 0x553   : > { %v2673_v50 = vpop.eup %1968  ;;  %1972 = vpow2.f32 %v1117_v57  ;;  %v772_v1 = vshrl.u32 %v763_v62, 16 }
 0x554   : > { %v1119_v52 = vsel %vm910_vm3, %v2673_v50, 0.0  ;;  %1974 = vpow2.f32 %v1115_v58 }
 0x555   : > { %v2677_v53 = vpop.eup %1970  ;;  %1120 = vadd.xlane.f32.xlu0 %v1119_v52 }
 0x556   : > { %v1122_v27 = vsel %vm910_vm3, %v2677_v53, 0.0 }
 0x557   : > { %1123 = vadd.xlane.f32.xlu1 %v1122_v27 }
 0x55d   : > { %v2683_v59 = vpop.eup %1972 }
 0x55e   : > { %v2685_v60 = vpop.eup %1974  ;;  %v1128_v61 = vsel %vm910_vm3, %v2683_v59, 0.0 }
 0x568   : > { %764 = vrot.lane.b32.xlu1 %v2601_v28, %s2267_s16  ;;  %v1125_v28 = vsel %vm910_vm3, %v2685_v60, 0.0 }
 0x56b   : > { %766 = vrot.lane.b32.xlu0 %v2604_v29, %s2267_s16  ;;  %v761_v29 = vpop.permute.xlu0 %760 }
 0x56c   : > { %v771_v3 = vshrl.u32 %v761_v29, 16  ;;  %v770_v5 = vpack.i.b16 %v763_v62, %v761_v29 }
 0x56e   : > { %v773_v6 = vpack.i.b16 %v772_v1, %v771_v3  ;;  %v787_v12 = vrot.slane %v770_v5, %v2609_v42 }
 0x570   : > { %v821_v15 = vrot.slane %v773_v6, %v2609_v42 }
 0x58a   : > { %1129 = vadd.xlane.f32.xlu0 %v1128_v61 }
 0x58c   : > { %1126 = vadd.xlane.f32.xlu1 %v1125_v28 }
 0x5e2   : > { %v1121_v63 = vpop.xlane.xlu0 %1120 }
 0x5e3   : > { %1976 = vrcp.f32 %v1121_v63 }
 0x5e4   : > { %v1124_v2 = vpop.xlane.xlu1 %1123 }
 0x5e5   : > { %1978 = vrcp.f32 %v1124_v2 }
 0x5e6   : > { %v767_v4 = vpop.permute.xlu0 %766 }
 0x5e7   : > { %v778_v9 = vshrl.u32 %v767_v4, 16 }
 0x5e8   : > { %v765_v7 = vpop.permute.xlu1 %764 }
 0x5e9   : > { %v776_v10 = vpack.i.b16 %v767_v4, %v765_v7  ;;  %v777_v11 = vshrl.u32 %v765_v7, 16 }
 0x5eb   : > { %v779_v13 = vpack.i.b16 %v778_v9, %v777_v11  ;;  %v795_v14 = vrot.slane %v776_v10, %v2609_v42 }
 0x5ed   : > { %v796_v16 = vcombine.low %v787_v12, %v795_v14  ;;  %v797_v17 = vcombine.high %v787_v12, %v795_v14  ;;  %v829_v18 = vrot.slane %v779_v13, %v2609_v42  ;;  %v1977_v38 = vpop.eup %1976 }
 0x5ee   : > { %v1135_v45 = vmul.f32 %v1977_v38, %v2673_v50 }
 0x5ef   : > { %v804_v19 = vrot.slane %v796_v16, %v2612_v51  ;;  %v811_v20 = vrot.slane %v797_v17, %v2612_v51  ;;  %v830_v21 = vcombine.low %v821_v15, %v829_v18  ;;  %v831_v22 = vcombine.high %v821_v15, %v829_v18  ;;  %v1979_v41 = vpop.eup %1978 }
 0x5f0   : > { %v1136_v27 = vmul.f32 %v1979_v41, %v2677_v53  ;;  %v1139_v61 = vpack.c.bf16 %v1135_v45, %v1135_v45 }
 0x5f1   : > { %v838_v23 = vrot.slane %v830_v21, %v2612_v51  ;;  %v845_v24 = vrot.slane %v831_v22, %v2612_v51  ;;  %v848_v26 = vcombine.low %v804_v19, %v811_v20  ;;  %v1728_v30 = vcombine.high %v804_v19, %v811_v20 }
 0x5f2   : > { %v1140_v28 = vpack.c.bf16 %v1136_v27, %v1136_v27 }
 0x5f3   : > { %v855_v31 = vrot.slane %v848_v26, %v2609_v42  ;;  %v863_v32 = vrot.slane %v1728_v30, %v2609_v42  ;;  %v873_v33 = vcombine.low %v838_v23, %v845_v24  ;;  %v1729_v34 = vcombine.high %v838_v23, %v845_v24 }
 0x5f5   : > { %v880_v35 = vrot.slane %v873_v33, %v2609_v42  ;;  %v888_v36 = vrot.slane %v1729_v34, %v2609_v42  ;;  %v864_v37 = vcombine.low %v855_v31, %v863_v32  ;;  %v1964_v33 = vld [vmem:[#allocation11] sm:$0xff]  }
 0x5f7   : > { %v871_v39 = vrot.slane %v864_v37, %v2612_v51  ;;  %v889_v40 = vcombine.low %v880_v35, %v888_v36 }
 0x5f9   : > { %v896_v43 = vrot.slane %v889_v40, %v2612_v51  ;;  %v872_v44 = vcombine.high %v871_v39, %v2266_v47  ;;  %v901_v48 = vshrl.u32 %v871_v39, 16 }
 0x5fb   : > { %v900_v46 = vpack.i.b16 %v896_v43, %v871_v39  ;;  %v902_v49 = vshrl.u32 %v896_v43, 16  ;;  %v897_v52 = vcombine.high %v896_v43, %v2266_v47  ;;  %v907_v25 = vshrl.u32 %v872_v44, 16  ;;  %v1965_v43 = vld [vmem:[#allocation11 + $0x8] sm:$0xff]  }
 0x5fd   : > { %v1148_v54 = vsel %vm1146_vm4, %v900_v46, 0  ;;  %v903_v55 = vpack.i.b16 %v902_v49, %v901_v48  ;;  %v906_v56 = vpack.i.b16 %v897_v52, %v872_v44  ;;  %v908_v57 = vshrl.u32 %v897_v52, 16 }
 0x5fe   : > { %1803 = vmatpush3.bf16.msra.mxu1 %v1148_v54 }
 0x5ff   : > { %v1194_v58 = vsel %vm1146_vm4, %v903_v55, 0  ;;  %1814 = vmatprep.subr.bf16.mxu1 %v2258_v8  ;;  %v909_v50 = vpack.i.b16 %v908_v57, %v907_v25  ;;  %v1240_v47 = vsel %vm1146_vm4, %v906_v56, 0 }
 0x600   : > { %1809 = vmatpush3.bf16.msra.mxu0 %v1194_v58 }
 0x601   : > { %1805 = vmatmul.mubr.msk.bf16.vlgmr.msra.gmra.mrb[8].mxu1 %vm910_vm3, %v1139_v61  ;;  %1820 = vmatprep.subr.bf16.mxu0 %v2258_v8  ;;  %v1286_v53 = vsel %vm1146_vm4, %v909_v50, 0 }
 0x602   : > { %1815 = vmatpush3.bf16.msra.mxu1 %v1240_v47  ;;  %1816 = vmatprep.mubr.msk.bf16.mxu1 %vm2259_vm1, %v2258_v8 }
 0x603   : > { %1811 = vmatmul.mubr.msk.bf16.vlgmr.msra.gmra.mrb[12].mxu0 %vm910_vm3, %v1140_v28  ;;  %1826 = vmatprep.subr.bf16.mxu1 %v2258_v8 }
 0x604   : > { %1821 = vmatpush3.bf16.msra.mxu0 %v1286_v53  ;;  %1822 = vmatprep.mubr.msk.bf16.mxu0 %vm2259_vm1, %v2258_v8 }
 0x617   : > { %v1130_v29 = vpop.xlane.xlu0 %1129 }
 0x618   : > { %1980 = vrcp.f32 %v1130_v29 }
 0x619   : > { %v1127_v62 = vpop.xlane.xlu1 %1126 }
 0x61a   : > { %1982 = vrcp.f32 %v1127_v62 }
 0x622   : > { %v1981_v63 = vpop.eup %1980 }
 0x623   : > { %v1138_v1 = vmul.f32 %v1981_v63, %v2683_v59 }
 0x624   : > { %v1983_v2 = vpop.eup %1982 }
 0x625   : > { %v1137_v3 = vmul.f32 %v1983_v2, %v2685_v60  ;;  %v1142_v4 = vpack.c.bf16 %v1138_v1, %v1138_v1 }
 0x627   : > { %1823 = vmatmul.mubr.msk.bf16.vlgmr.msra.gmra.mrb[16].mxu0 %vm910_vm3, %v1142_v4  ;;  %v1141_v5 = vpack.c.bf16 %v1137_v3, %v1137_v3 }
 0x629   : > { %1817 = vmatmul.mubr.msk.bf16.vlgmr.msra.gmra.mrb[12].mxu1 %vm910_vm3, %v1141_v5  ;;  %v1743_v5 = vld [vmem:[#allocation12] ss:$0 sm:$0xff] }
 0x62a   : > { %1830 = vmatprep.mubr.msk.bf16.mxu1 %vm2259_vm1, %v2258_v8  ;;  %1827 = vmatpush3.bf16.msra.mxu1 %v1964_v33 }
 0x62b   : > { %1828 = vmatprep.subr.bf16.mxu1 %v2258_v8 }
 0x62e   : > { %1829 = vmatpush3.bf16.msra.mxu1 %v1965_v43 }
 0x6d4   : > { %v1184_v6 = vpop.f32.mrb[8].mxu1 }
 0x6d5   : > { %v1806_v7 = vpop.f32.mrb[9].mxu1 }
 0x6d6   : > { %v1187_v9 = vpop.f32.mrb[10].mxu1  ;;  %v1230_v10 = vpop.f32.mrb[12].mxu0 }
 0x6d7   : > { %v1807_v11 = vpop.f32.mrb[11].mxu1  ;;  %v1812_v12 = vpop.f32.mrb[13].mxu0 }
 0x6d8   : > { %v1233_v13 = vpop.f32.mrb[14].mxu0 }
 0x6d9   : > { %v1813_v59 = vpop.f32.mrb[15].mxu0 }
 0x6fa   : > { %v1322_v14 = vpop.f32.mrb[16].mxu0 }
 0x6fb   : > { %v1344_v15 = vcombine.low %v1230_v10, %v1322_v14  ;;  %v1345_v60 = vcombine.high %v1230_v10, %v1322_v14  ;;  %v1824_v16 = vpop.f32.mrb[17].mxu0 }
 0x6fc   : > { %v1276_v17 = vpop.f32.mrb[12].mxu1  ;;  %v1325_v18 = vpop.f32.mrb[18].mxu0 }
 0x6fd   : > { %v1328_v19 = vcombine.low %v1184_v6, %v1276_v17  ;;  %v1329_v20 = vcombine.high %v1184_v6, %v1276_v17  ;;  %v1818_v21 = vpop.f32.mrb[13].mxu1  ;;  %v1825_v22 = vpop.f32.mrb[19].mxu0  ;;  %v1352_v24 = vrot.slane %v1344_v15, %v2609_v42  ;;  %v1359_v26 = vrot.slane %v1345_v60, %v2609_v42 }
 0x6fe   : > { %v1279_v23 = vpop.f32.mrb[14].mxu1 }
 0x6ff   : > { %v1336_v30 = vrot.slane %v1328_v19, %v2609_v42  ;;  %v1343_v31 = vrot.slane %v1329_v20, %v2609_v42  ;;  %v1819_v32 = vpop.f32.mrb[15].mxu1 }
 0x701   : > { %v1360_v34 = vcombine.low %v1336_v30, %v1352_v24  ;;  %v1361_v35 = vcombine.high %v1336_v30, %v1352_v24  ;;  %v1376_v36 = vcombine.low %v1343_v31, %v1359_v26  ;;  %v1377_v37 = vcombine.high %v1343_v31, %v1359_v26 }
 0x703   : > { %v1368_v38 = vrot.slane %v1360_v34, %v2612_v51  ;;  %v1375_v39 = vrot.slane %v1361_v35, %v2612_v51  ;;  %v1384_v40 = vrot.slane %v1376_v36, %v2612_v51  ;;  %v1391_v41 = vrot.slane %v1377_v37, %v2612_v51 }
 0x705   : > { %v1396_v44 = vcombine.low %v1368_v38, %v1375_v39  ;;  %v1738_v45 = vcombine.high %v1368_v38, %v1375_v39  ;;  %v1412_v46 = vcombine.low %v1384_v40, %v1391_v41  ;;  %v1739_v48 = vcombine.high %v1384_v40, %v1391_v41 }
 0x707   : > { %v1403_v49 = vrot.slane %v1396_v44, %v2609_v42  ;;  %v1411_v52 = vrot.slane %v1738_v45, %v2609_v42  ;;  %v1419_v27 = vrot.slane %v1412_v46, %v2609_v42  ;;  %v1427_v25 = vrot.slane %v1739_v48, %v2609_v42 }
 0x709   : > { %v1429_v54 = vcombine.high %v1403_v49, %v1411_v52  ;;  %v1445_v55 = vcombine.high %v1419_v27, %v1427_v25  ;;  %v1428_v56 = vcombine.low %v1403_v49, %v1411_v52  ;;  %v1444_v57 = vcombine.low %v1419_v27, %v1427_v25 }
 0x70b   : > { %v1443_v8 = vrot.slane %v1429_v54, %v2612_v51  ;;  %v1459_v58 = vrot.slane %v1445_v55, %v2612_v51  ;;  %v1436_v61 = vrot.slane %v1428_v56, %v2612_v51  ;;  %v1452_v50 = vrot.slane %v1444_v57, %v2612_v51 }
 0x70d   : > { %v1462_v47 = vcombine.low %v1443_v8, %v1459_v58  ;;  %v1461_v28 = vcombine.high %v1436_v61, %v1452_v50  ;;  %v1463_v53 = vcombine.high %v1443_v8, %v1459_v58  ;;  %v1460_v29 = vcombine.low %v1436_v61, %v1452_v50 }
 0x70f   : > { %1469 = vrot.lane.b32.xlu1 %v1462_v47, %s2268_s10  ;;  %1465 = vrot.lane.b32.xlu0 %v1461_v28, %s2269_s19 }
 0x713   : > { %1473 = vrot.lane.b32.xlu1 %v1463_v53, %s2270_s9 }
 0x781   : > { %v1470_v42 = vpop.permute.xlu1 %1469  ;;  %v1466_v62 = vpop.permute.xlu0 %1465 }
 0x782   : > { %v1476_v63 = vsel %vm910_vm3, %v1460_v29, %v1466_v62 }
 0x783   : > { %v1478_v51 = vsel %vm1477_vm5, %v1476_v63, %v1470_v42 }
 0x785   : > { %v1474_v1 = vpop.permute.xlu1 %1473 }
 0x786   : > { %v1480_v2 = vsel %vm1479_vm6, %v1478_v51, %v1474_v1 }
 0x787   : > { %v1481_v3 = vpack.c.bf16 %v1480_v2, %v1480_v2 }
 0x789   : > { %1831 = vmatmul.mubr.msk.bf16.vlgmr.msra.gmra.mrb[16].mxu1 %vm356_vm0, %v1481_v3 }
 0x85c   : > { %v1536_v4 = vpop.f32.mrb[16].mxu1 }
 0x85d   : > { %v1544_v6 = vadd.f32 %v1536_v4, %v2572_v0  ;;  %v1832_v7 = vpop.f32.mrb[17].mxu1 }
 0x85e   : > { %v1539_v9 = vpop.f32.mrb[18].mxu1 }
 0x85f   : > { %v1552_v10 = vadd.f32 %v1743_v5, %v1544_v6  ;;  %v1833_v11 = vpop.f32.mrb[19].mxu1 }
 0x861   : > { %1553 = vst.msk [vmem:[%s347_s14] sm:$0xff] %vm356_vm0, %v1552_v10 }
 0x862   : > { %2167 = shalt.err (!%p2164_p8)
}
 0x863   : > { %s2168_s1 = scalar_lea.hbm %s2754_s28, 128  ;;  %s2172_s19 = scalar_lea.hbm %s2810_s6, 256 }
 0x864   : > { %p2169_p9 = scmp.ne.s32.totalorder %s2754_s28, %s2168_s1  ;;  %p2173_p10 = scmp.lt.u32.totalorder %s2754_s28, %s2810_s6 }
 0x865   : > { %p2174_p4 = scmp.lt.u32.totalorder %s2172_s19, %s2168_s1  ;;  %p2176_p6 = scmp.lt.u32.totalorder %s2168_s1, %s2754_s28 }
 0x866   : > { %p2170_p1 = pnand %p2169_p9, %p2833_p2 }
 0x867   : > { %p2175_p13 = por %p2174_p4, %p2173_p10 }
 0x868   : > { %p2171_p3 = pneg %p2170_p1 }
 0x869   : > { %p2177_p5 = por %p2176_p6, %p2175_p13 }
 0x86b   : > { %p2178_p7 = pnand %p2177_p5, %p2171_p3 }
 0x86d   : > { %2181 = shalt.err (!%p2178_p7)
}
 0x86e   : > { %1856 = dma.vmem_to_hbm [thread:$0]  (%p2833_p2), %s2756_s12, 128, %s2754_s28, %s1555_s24  }
 0x86f PF: > { %s1581_s14 = sand.u32 1, %s2228_s21   ;;  %p2834_p11 = scmp.ne.s32.totalorder %s2829_s13, 0 }
 0x870   : > { %p2835_p12 = scmp.ge.s32.totalorder %s2248_s26, 2  ;;  %s1582_s27 = scalar_lea.sflag [#allocation5], %s1581_s14 }
 0x872   : > { %p1879_p0 = pnand %p2835_p12, %p2834_p11 }
 0x874   : > { %2223 = dma.done.wait (!%p1879_p0), %s1582_s27, 128  }
 0x875   : > { %2225 = vsyncadd (!%p1879_p0), %s1582_s27, 4294967168  ;;  %s25_s26 = sadd.s32 1, %s2248_s26   ;;  %s2836_s21 = smov %s2232_s22 }
 0x876   : > { %p22_p8 = scmp.ge.s32.totalorder %s25_s26, 4   ;;  %s2837_s22 = smov %s2236_s23 }
 0x877   : > { %s2838_s23 = smov %s2501_s7  ;;  %s2839_s24 = smov %s2244_s25 }
 0x878   : > { %s2840_s25 = smov %s2842_s8  ;;  %24 = sbr.rel (!%p22_p8) target bundleno = 11 (0xb), region = 115 }
 0x87f   :  { %1587 = vsyncpa [#allocation4], 1 }
 0x880   :  { %1589 = vsyncpa [#allocation4 + $0x1], 1 }
 0x881   :  { %1590 = vsyncpa [#allocation7], 1 }
 0x882   :  { %1591 = vsyncpa [#allocation10], 1 }
 0x883   :  { %1592 = vsyncpa [#allocation13], 1 }
 0x884   :  { %1593 = vsyncpa [#allocation5], 1 }
 0x885   :  { %1595 = vsyncpa [#allocation5 + $0x1], 1 }

</bundles_post_ra>
